<compile_context>
chip_gen: v5e
topology: v5e:2x2
jax: 0.10.0
libtpu: 0.0.40
codegen_flags: <defaults>
</compile_context>

<pallas_src>
import jax
import jax.numpy as jnp
from jax import lax
from jax.experimental import pallas as pl
from jax.experimental.pallas import tpu as pltpu


def upblock_kernel(x1_ref, x2_ref, B1_ref, b1_ref, B2_ref, b2_ref, T_ref,
                   bt_ref, out_ref, x1p_ref, x2p_ref, hp_ref):
    # x1_ref, x2_ref : (1, H, W*C)            bf16  lane-fused (w, c) images
    # B1_ref         : (2, 3, (W+2)*C, W*C)   bf16  banded conv1 weights;
    #                                               [0]=x2 half, [1]=x1 half
    # b1_ref         : (1, W*C)               f32   bias tiled over w
    # B2_ref         : (3, (W+2)*C, W*C)      bf16  banded conv2 weights
    # b2_ref         : (1, W*C)               f32
    # T_ref          : (W*C, 4*W*O)           bf16  block-diag deconv weights,
    #                                               cols ordered (dy, j, dx, o)
    # bt_ref         : (1, 4*W*O)             f32
    # out_ref        : (1, H, 4*W*O)          bf16  out[0, i, dy*2WO + j*2O + dx*O + o]
    # x1p/x2p/hp     : (H+2, (W+2)*C)         bf16  VMEM zero-padded fused images
    H, WC = x1_ref.shape[1], x1_ref.shape[2]
    WpC = x1p_ref.shape[1]
    C = (WpC - WC) // 2          # per-pixel channel count of the padded images

    # Zero only the 1-pixel halo (top/bottom rows + left/right lane strips).
    # Interiors are fully overwritten every grid step, so this stays correct
    # even when the batch axis is sharded across cores.
    def zero_border(ref):
        Hp, L = ref.shape
        ref[0:1, :] = jnp.zeros((1, L), ref.dtype)
        ref[Hp - 1:Hp, :] = jnp.zeros((1, L), ref.dtype)
        ref[:, 0:C] = jnp.zeros((Hp, C), ref.dtype)
        ref[:, L - C:L] = jnp.zeros((Hp, C), ref.dtype)

    zero_border(x1p_ref)
    zero_border(x2p_ref)
    zero_border(hp_ref)

    # bf16 interiors, written once, full-width lane-dense stores, no casts.
    x1p_ref[1:H + 1, C:C + WC] = x1_ref[0]
    x2p_ref[1:H + 1, C:C + WC] = x2_ref[0]

    # --- conv1 on cat([x2, x1], C): 3 banded matmuls per input half.  The dx
    #     shift + channel contraction are folded into the banded weights, so
    #     there is no im2col gather at all. ---
    acc = b1_ref[...]                                            # (1, W*C) f32
    for dy in range(3):
        acc = acc + jnp.dot(x2p_ref[dy:dy + H, :], B1_ref[0, dy],
                            preferred_element_type=jnp.float32)
        acc = acc + jnp.dot(x1p_ref[dy:dy + H, :], B1_ref[1, dy],
                            preferred_element_type=jnp.float32)
    h1 = jnp.maximum(acc, 0.0)                                   # (H, W*C) f32
    hp_ref[1:H + 1, C:C + WC] = h1.astype(hp_ref.dtype)          # single bf16 cast

    # --- conv2: 3 banded matmuls ---
    acc = b2_ref[...]
    for dy in range(3):
        acc = acc + jnp.dot(hp_ref[dy:dy + H, :], B2_ref[dy],
                            preferred_element_type=jnp.float32)
    h2 = jnp.maximum(acc, 0.0).astype(jnp.bfloat16)              # (H, W*C)

    # --- ConvTranspose2d(k=2, s=2) + ReLU: ONE block-diagonal matmul, then a
    #     single unmasked full-block lane-dense store (last dim 4*W*O). ---
    y = jnp.dot(h2, T_ref[...], preferred_element_type=jnp.float32)
    out_ref[0] = jnp.maximum(y + bt_ref[...], 0.0).astype(out_ref.dtype)


def upblock_forward(x1, x2, w1, b1, w2, b2, wt, bt, out_dtype=jnp.bfloat16):
    """x1, x2: (N, C, H, W) float32 (PyTorch NCHW). Returns (N, O, 2H, 2W) f32."""
    N, C, H, W = x1.shape
    O = wt.shape[1]
    cdt = jnp.bfloat16
    Wp = W + 2
    WC, WpC, W2O = W * C, Wp * C, W * 2 * O

    # NCHW -> NHWC -> lane-fused (N, H, W*C) (pure reshape), bf16.
    x1f = jnp.transpose(x1, (0, 2, 3, 1)).reshape(N, H, WC).astype(cdt)
    x2f = jnp.transpose(x2, (0, 2, 3, 1)).reshape(N, H, WC).astype(cdt)

    # Banded conv weight: B[dy][(j+dx)*Cin + c, j*Cout + co] = w[co, c, dy, dx].
    # S[dx, jp, j] = 1 iff jp == j + dx (shifted identities handle the dx shift
    # and the left/right zero padding columns).
    S = jnp.stack([jnp.eye(Wp, W, k=-dx, dtype=jnp.float32) for dx in range(3)])

    def banded(w):                                   # w: (Cout, Cin, 3, 3)
        Cin, Cout = w.shape[1], w.shape[0]
        Bm = jnp.einsum('xpq,ocdx->dpcqo', S, w)     # (3, Wp, Cin, W, Cout)
        return Bm.reshape(3, Wp * Cin, W * Cout)

    # conv1 split into the x2 (channels 0:C) and x1 (channels C:2C) halves of
    # the concatenated input -> the concat is never materialized.
    B1 = jnp.stack([banded(w1[:, :C]), banded(w1[:, C:])]).astype(cdt)
    B2 = banded(w2).astype(cdt)

    # Block-diagonal deconv weight: T[j*C + c, dy*W2O + j*2O + dx*O + o] = wt[c,o,dy,dx].
    T = jnp.einsum('pq,codk->pcdqko', jnp.eye(W, dtype=jnp.float32), wt)
    T = T.reshape(W * C, 2 * W2O).astype(cdt)

    b1_k = jnp.tile(b1, W).reshape(1, WC).astype(jnp.float32)
    b2_k = jnp.tile(b2, W).reshape(1, WC).astype(jnp.float32)
    bt_k = jnp.tile(bt, 2 * W * 2).reshape(1, 2 * W2O).astype(jnp.float32)

    out = pl.pallas_call(
        upblock_kernel,
        out_shape=jax.ShapeDtypeStruct((N, H, 2 * W2O), out_dtype),
        grid_spec=pltpu.PrefetchScalarGridSpec(
            num_scalar_prefetch=0,
            grid=(N,),
            in_specs=[
                pl.BlockSpec((1, H, WC), lambda n: (n, 0, 0)),
                pl.BlockSpec((1, H, WC), lambda n: (n, 0, 0)),
                pl.BlockSpec((2, 3, WpC, WC), lambda n: (0, 0, 0, 0)),
                pl.BlockSpec((1, WC), lambda n: (0, 0)),
                pl.BlockSpec((3, WpC, WC), lambda n: (0, 0, 0)),
                pl.BlockSpec((1, WC), lambda n: (0, 0)),
                pl.BlockSpec((WC, 2 * W2O), lambda n: (0, 0)),
                pl.BlockSpec((1, 2 * W2O), lambda n: (0, 0)),
            ],
            out_specs=pl.BlockSpec((1, H, 2 * W2O), lambda n: (n, 0, 0)),
            scratch_shapes=[
                pltpu.VMEM((H + 2, WpC), cdt),        # x1 padded (fused)
                pltpu.VMEM((H + 2, WpC), cdt),        # x2 padded (fused)
                pltpu.VMEM((H + 2, WpC), cdt),        # conv1 output padded
            ],
        ),
        compiler_params=pltpu.CompilerParams(
            dimension_semantics=("parallel",)),
    )(x1f, x2f, B1, b1_k, B2, b2_k, T, bt_k)

    # (N, H, 4*W*O) -> (N, 2H, 2W, O) is a pure reshape (lane order is already
    # (dy, j, dx, o)); NHWC -> NCHW + f32 only at the API boundary.
    y = out.reshape(N, 2 * H, 2 * W, O)
    return jnp.transpose(y, (0, 3, 1, 2)).astype(jnp.float32)


def reference_forward(x1, x2, w1, b1, w2, b2, wt, bt):
    """Pure-JAX f32 reference matching PyTorch UpBlock.forward (NCHW)."""
    dn = ("NCHW", "OIHW", "NCHW")
    x = jnp.concatenate([x2, x1], axis=1)
    h = lax.conv_general_dilated(x, w1, (1, 1), ((1, 1), (1, 1)),
                                 dimension_numbers=dn)
    h = jax.nn.relu(h + b1[None, :, None, None])
    h = lax.conv_general_dilated(h, w2, (1, 1), ((1, 1), (1, 1)),
                                 dimension_numbers=dn)
    h = jax.nn.relu(h + b2[None, :, None, None])
    # ConvTranspose2d(k=2, s=2): out[n,o,2i+d,2j+k] = sum_c h[n,c,i,j]*wt[c,o,d,k]
    y = jnp.einsum("ncij,codk->noidjk", h, wt)
    N, O, H, _, W, _ = y.shape
    y = y.reshape(N, O, 2 * H, 2 * W) + bt[None, :, None, None]
    return jax.nn.relu(y)


if __name__ == "__main__":
    N, C, O, H, W = 2, 4, 4, 16, 16   # in_channels=4, out_channels=4
    key = jax.random.PRNGKey(0)
    k = jax.random.split(key, 8)
    x1 = jax.random.normal(k[0], (N, C, H, W), jnp.float32)
    x2 = jax.random.normal(k[1], (N, C, H, W), jnp.float32)
    # DoubleConvBlock(in*2, in): conv1 (C, 2C, 3, 3), conv2 (C, C, 3, 3)
    w1 = jax.random.normal(k[2], (C, 2 * C, 3, 3), jnp.float32) * 0.1
    b1 = jax.random.normal(k[3], (C,), jnp.float32) * 0.1
    w2 = jax.random.normal(k[4], (C, C, 3, 3), jnp.float32) * 0.1
    b2 = jax.random.normal(k[5], (C,), jnp.float32) * 0.1
    # ConvTranspose2d(C, O, 2, 2): weight (C, O, 2, 2)
    wt = jax.random.normal(k[6], (C, O, 2, 2), jnp.float32) * 0.1
    bt = jax.random.normal(k[7], (O,), jnp.float32) * 0.1

    out = upblock_forward(x1, x2, w1, b1, w2, b2, wt, bt)
    out = jax.block_until_ready(out)
    assert out.shape == (N, O, 2 * H, 2 * W), out.shape

    ref = reference_forward(x1, x2, w1, b1, w2, b2, wt, bt)
    # bf16 activations/weights/output with f32 accumulation -> loosened tolerance.
    if not jnp.allclose(out, ref, atol=5e-2, rtol=5e-2):
        raise AssertionError(
            f"mismatch vs reference, max abs err = {jnp.max(jnp.abs(out - ref))}")
    print("KERNEL_OK")
</pallas_src>

<mosaic_0001>
module attributes {stable_mosaic.version = 11 : i64} {
  func.func @upblock_kernel(%arg0: i32, %arg1: memref<1x16x64xbf16, #tpu.memory_space<vmem>>, %arg2: memref<1x16x64xbf16, #tpu.memory_space<vmem>>, %arg3: memref<2x3x72x64xbf16, #tpu.memory_space<vmem>>, %arg4: memref<1x64xf32, #tpu.memory_space<vmem>>, %arg5: memref<3x72x64xbf16, #tpu.memory_space<vmem>>, %arg6: memref<1x64xf32, #tpu.memory_space<vmem>>, %arg7: memref<64x256xbf16, #tpu.memory_space<vmem>>, %arg8: memref<1x256xf32, #tpu.memory_space<vmem>>, %arg9: memref<1x16x256xbf16, #tpu.memory_space<vmem>>, %arg10: memref<18x72xbf16, #tpu.memory_space<vmem>>, %arg11: memref<18x72xbf16, #tpu.memory_space<vmem>>, %arg12: memref<18x72xbf16, #tpu.memory_space<vmem>>) attributes {dimension_semantics = [#tpu.dimension_semantics<parallel>], iteration_bounds = array<i64: 2>, scalar_prefetch = 0 : i64, scratch_operands = 3 : i64, tpu.core_type = #tpu.core_type<tc>, window_params = [{transform_indices = @transform_0, window_bounds = array<i64: 1, 16, 64>}, {transform_indices = @transform_1, window_bounds = array<i64: 1, 16, 64>}, {pipeline_mode = #tpu.pipeline_mode<synchronous>, transform_indices = @transform_2, window_bounds = array<i64: 2, 3, 72, 64>}, {pipeline_mode = #tpu.pipeline_mode<synchronous>, transform_indices = @transform_3, window_bounds = array<i64: 1, 64>}, {pipeline_mode = #tpu.pipeline_mode<synchronous>, transform_indices = @transform_4, window_bounds = array<i64: 3, 72, 64>}, {pipeline_mode = #tpu.pipeline_mode<synchronous>, transform_indices = @transform_5, window_bounds = array<i64: 1, 64>}, {pipeline_mode = #tpu.pipeline_mode<synchronous>, transform_indices = @transform_6, window_bounds = array<i64: 64, 256>}, {pipeline_mode = #tpu.pipeline_mode<synchronous>, transform_indices = @transform_7, window_bounds = array<i64: 1, 256>}, {transform_indices = @transform_8, window_bounds = array<i64: 1, 16, 256>}]} {
    %cst = arith.constant 0.000000e+00 : bf16
    %0 = vector.broadcast %cst : bf16 to vector<1x72xbf16>
    %c0 = arith.constant 0 : index
    %c0_0 = arith.constant 0 : index
    %1 = vector.load %arg10[%c0, %c0_0] : memref<18x72xbf16, #tpu.memory_space<vmem>>, vector<1x72xbf16>
    tpu.vector_store %arg10[%c0, %c0_0], %0 {strides = array<i32>} : memref<18x72xbf16, #tpu.memory_space<vmem>>, vector<1x72xbf16>,
    %cst_1 = arith.constant 0.000000e+00 : bf16
    %2 = vector.broadcast %cst_1 : bf16 to vector<1x72xbf16>
    %c17 = arith.constant 17 : index
    %c0_2 = arith.constant 0 : index
    %3 = vector.load %arg10[%c17, %c0_2] : memref<18x72xbf16, #tpu.memory_space<vmem>>, vector<1x72xbf16>
    tpu.vector_store %arg10[%c17, %c0_2], %2 {strides = array<i32>} : memref<18x72xbf16, #tpu.memory_space<vmem>>, vector<1x72xbf16>,
    %cst_3 = arith.constant 0.000000e+00 : bf16
    %4 = vector.broadcast %cst_3 : bf16 to vector<18x4xbf16>
    %c0_4 = arith.constant 0 : index
    %c0_5 = arith.constant 0 : index
    %5 = vector.load %arg10[%c0_4, %c0_5] : memref<18x72xbf16, #tpu.memory_space<vmem>>, vector<18x4xbf16>
    tpu.vector_store %arg10[%c0_4, %c0_5], %4 {strides = array<i32>} : memref<18x72xbf16, #tpu.memory_space<vmem>>, vector<18x4xbf16>,
    %cst_6 = arith.constant 0.000000e+00 : bf16
    %6 = vector.broadcast %cst_6 : bf16 to vector<18x4xbf16>
    %c0_7 = arith.constant 0 : index
    %c68 = arith.constant 68 : index
    %7 = vector.load %arg10[%c0_7, %c68] : memref<18x72xbf16, #tpu.memory_space<vmem>>, vector<18x4xbf16>
    tpu.vector_store %arg10[%c0_7, %c68], %6 {strides = array<i32>} : memref<18x72xbf16, #tpu.memory_space<vmem>>, vector<18x4xbf16>,
    %cst_8 = arith.constant 0.000000e+00 : bf16
    %8 = vector.broadcast %cst_8 : bf16 to vector<1x72xbf16>
    %c0_9 = arith.constant 0 : index
    %c0_10 = arith.constant 0 : index
    %9 = vector.load %arg11[%c0_9, %c0_10] : memref<18x72xbf16, #tpu.memory_space<vmem>>, vector<1x72xbf16>
    tpu.vector_store %arg11[%c0_9, %c0_10], %8 {strides = array<i32>} : memref<18x72xbf16, #tpu.memory_space<vmem>>, vector<1x72xbf16>,
    %cst_11 = arith.constant 0.000000e+00 : bf16
    %10 = vector.broadcast %cst_11 : bf16 to vector<1x72xbf16>
    %c17_12 = arith.constant 17 : index
    %c0_13 = arith.constant 0 : index
    %11 = vector.load %arg11[%c17_12, %c0_13] : memref<18x72xbf16, #tpu.memory_space<vmem>>, vector<1x72xbf16>
    tpu.vector_store %arg11[%c17_12, %c0_13], %10 {strides = array<i32>} : memref<18x72xbf16, #tpu.memory_space<vmem>>, vector<1x72xbf16>,
    %cst_14 = arith.constant 0.000000e+00 : bf16
    %12 = vector.broadcast %cst_14 : bf16 to vector<18x4xbf16>
    %c0_15 = arith.constant 0 : index
    %c0_16 = arith.constant 0 : index
    %13 = vector.load %arg11[%c0_15, %c0_16] : memref<18x72xbf16, #tpu.memory_space<vmem>>, vector<18x4xbf16>
    tpu.vector_store %arg11[%c0_15, %c0_16], %12 {strides = array<i32>} : memref<18x72xbf16, #tpu.memory_space<vmem>>, vector<18x4xbf16>,
    %cst_17 = arith.constant 0.000000e+00 : bf16
    %14 = vector.broadcast %cst_17 : bf16 to vector<18x4xbf16>
    %c0_18 = arith.constant 0 : index
    %c68_19 = arith.constant 68 : index
    %15 = vector.load %arg11[%c0_18, %c68_19] : memref<18x72xbf16, #tpu.memory_space<vmem>>, vector<18x4xbf16>
    tpu.vector_store %arg11[%c0_18, %c68_19], %14 {strides = array<i32>} : memref<18x72xbf16, #tpu.memory_space<vmem>>, vector<18x4xbf16>,
    %cst_20 = arith.constant 0.000000e+00 : bf16
    %16 = vector.broadcast %cst_20 : bf16 to vector<1x72xbf16>
    %c0_21 = arith.constant 0 : index
    %c0_22 = arith.constant 0 : index
    %17 = vector.load %arg12[%c0_21, %c0_22] : memref<18x72xbf16, #tpu.memory_space<vmem>>, vector<1x72xbf16>
    tpu.vector_store %arg12[%c0_21, %c0_22], %16 {strides = array<i32>} : memref<18x72xbf16, #tpu.memory_space<vmem>>, vector<1x72xbf16>,
    %cst_23 = arith.constant 0.000000e+00 : bf16
    %18 = vector.broadcast %cst_23 : bf16 to vector<1x72xbf16>
    %c17_24 = arith.constant 17 : index
    %c0_25 = arith.constant 0 : index
    %19 = vector.load %arg12[%c17_24, %c0_25] : memref<18x72xbf16, #tpu.memory_space<vmem>>, vector<1x72xbf16>
    tpu.vector_store %arg12[%c17_24, %c0_25], %18 {strides = array<i32>} : memref<18x72xbf16, #tpu.memory_space<vmem>>, vector<1x72xbf16>,
    %cst_26 = arith.constant 0.000000e+00 : bf16
    %20 = vector.broadcast %cst_26 : bf16 to vector<18x4xbf16>
    %c0_27 = arith.constant 0 : index
    %c0_28 = arith.constant 0 : index
    %21 = vector.load %arg12[%c0_27, %c0_28] : memref<18x72xbf16, #tpu.memory_space<vmem>>, vector<18x4xbf16>
    tpu.vector_store %arg12[%c0_27, %c0_28], %20 {strides = array<i32>} : memref<18x72xbf16, #tpu.memory_space<vmem>>, vector<18x4xbf16>,
    %cst_29 = arith.constant 0.000000e+00 : bf16
    %22 = vector.broadcast %cst_29 : bf16 to vector<18x4xbf16>
    %c0_30 = arith.constant 0 : index
    %c68_31 = arith.constant 68 : index
    %23 = vector.load %arg12[%c0_30, %c68_31] : memref<18x72xbf16, #tpu.memory_space<vmem>>, vector<18x4xbf16>
    tpu.vector_store %arg12[%c0_30, %c68_31], %22 {strides = array<i32>} : memref<18x72xbf16, #tpu.memory_space<vmem>>, vector<18x4xbf16>,
    %c0_32 = arith.constant 0 : index
    %c0_33 = arith.constant 0 : index
    %c0_34 = arith.constant 0 : index
    %24 = vector.load %arg1[%c0_32, %c0_33, %c0_34] : memref<1x16x64xbf16, #tpu.memory_space<vmem>>, vector<1x16x64xbf16>
    %25 = vector.shape_cast %24 : vector<1x16x64xbf16> to vector<16x64xbf16>
    %c1 = arith.constant 1 : index
    %c4 = arith.constant 4 : index
    %26 = vector.load %arg10[%c1, %c4] : memref<18x72xbf16, #tpu.memory_space<vmem>>, vector<16x64xbf16>
    tpu.vector_store %arg10[%c1, %c4], %25 {strides = array<i32>} : memref<18x72xbf16, #tpu.memory_space<vmem>>, vector<16x64xbf16>,
    %c0_35 = arith.constant 0 : index
    %c0_36 = arith.constant 0 : index
    %c0_37 = arith.constant 0 : index
    %27 = vector.load %arg2[%c0_35, %c0_36, %c0_37] : memref<1x16x64xbf16, #tpu.memory_space<vmem>>, vector<1x16x64xbf16>
    %28 = vector.shape_cast %27 : vector<1x16x64xbf16> to vector<16x64xbf16>
    %c1_38 = arith.constant 1 : index
    %c4_39 = arith.constant 4 : index
    %29 = vector.load %arg11[%c1_38, %c4_39] : memref<18x72xbf16, #tpu.memory_space<vmem>>, vector<16x64xbf16>
    tpu.vector_store %arg11[%c1_38, %c4_39], %28 {strides = array<i32>} : memref<18x72xbf16, #tpu.memory_space<vmem>>, vector<16x64xbf16>,
    %c0_40 = arith.constant 0 : index
    %c0_41 = arith.constant 0 : index
    %30 = vector.load %arg4[%c0_40, %c0_41] : memref<1x64xf32, #tpu.memory_space<vmem>>, vector<1x64xf32>
    %c0_42 = arith.constant 0 : index
    %c0_43 = arith.constant 0 : index
    %31 = vector.load %arg11[%c0_42, %c0_43] : memref<18x72xbf16, #tpu.memory_space<vmem>>, vector<16x72xbf16>
    %c0_44 = arith.constant 0 : index
    %c0_45 = arith.constant 0 : index
    %c0_46 = arith.constant 0 : index
    %c0_47 = arith.constant 0 : index
    %32 = vector.load %arg3[%c0_44, %c0_45, %c0_46, %c0_47] : memref<2x3x72x64xbf16, #tpu.memory_space<vmem>>, vector<1x1x72x64xbf16>
    %33 = vector.shape_cast %32 : vector<1x1x72x64xbf16> to vector<72x64xbf16>
    %cst_48 = arith.constant dense<0.000000e+00> : vector<16x64xf32>
    %34 = tpu.matmul %31, %33, %cst_48 {dimension_numbers = #tpu.dot_dimension_numbers<[1], [0], [0], [1], [0, 0, 1, 1], [], []>} : vector<16x72xbf16>, vector<72x64xbf16>, vector<16x64xf32> -> vector<16x64xf32>
    %35 = vector.broadcast %30 : vector<1x64xf32> to vector<16x64xf32>
    %36 = arith.addf %35, %34 : vector<16x64xf32>
    %c0_49 = arith.constant 0 : index
    %c0_50 = arith.constant 0 : index
    %37 = vector.load %arg10[%c0_49, %c0_50] : memref<18x72xbf16, #tpu.memory_space<vmem>>, vector<16x72xbf16>
    %c1_51 = arith.constant 1 : index
    %c0_52 = arith.constant 0 : index
    %c0_53 = arith.constant 0 : index
    %c0_54 = arith.constant 0 : index
    %38 = vector.load %arg3[%c1_51, %c0_52, %c0_53, %c0_54] : memref<2x3x72x64xbf16, #tpu.memory_space<vmem>>, vector<1x1x72x64xbf16>
    %39 = vector.shape_cast %38 : vector<1x1x72x64xbf16> to vector<72x64xbf16>
    %cst_55 = arith.constant dense<0.000000e+00> : vector<16x64xf32>
    %40 = tpu.matmul %37, %39, %cst_55 {dimension_numbers = #tpu.dot_dimension_numbers<[1], [0], [0], [1], [0, 0, 1, 1], [], []>} : vector<16x72xbf16>, vector<72x64xbf16>, vector<16x64xf32> -> vector<16x64xf32>
    %41 = arith.addf %36, %40 : vector<16x64xf32>
    %c1_56 = arith.constant 1 : index
    %c0_57 = arith.constant 0 : index
    %42 = vector.load %arg11[%c1_56, %c0_57] : memref<18x72xbf16, #tpu.memory_space<vmem>>, vector<16x72xbf16>
    %c0_58 = arith.constant 0 : index
    %c1_59 = arith.constant 1 : index
    %c0_60 = arith.constant 0 : index
    %c0_61 = arith.constant 0 : index
    %43 = vector.load %arg3[%c0_58, %c1_59, %c0_60, %c0_61] : memref<2x3x72x64xbf16, #tpu.memory_space<vmem>>, vector<1x1x72x64xbf16>
    %44 = vector.shape_cast %43 : vector<1x1x72x64xbf16> to vector<72x64xbf16>
    %cst_62 = arith.constant dense<0.000000e+00> : vector<16x64xf32>
    %45 = tpu.matmul %42, %44, %cst_62 {dimension_numbers = #tpu.dot_dimension_numbers<[1], [0], [0], [1], [0, 0, 1, 1], [], []>} : vector<16x72xbf16>, vector<72x64xbf16>, vector<16x64xf32> -> vector<16x64xf32>
    %46 = arith.addf %41, %45 : vector<16x64xf32>
    %c1_63 = arith.constant 1 : index
    %c0_64 = arith.constant 0 : index
    %47 = vector.load %arg10[%c1_63, %c0_64] : memref<18x72xbf16, #tpu.memory_space<vmem>>, vector<16x72xbf16>
    %c1_65 = arith.constant 1 : index
    %c1_66 = arith.constant 1 : index
    %c0_67 = arith.constant 0 : index
    %c0_68 = arith.constant 0 : index
    %48 = vector.load %arg3[%c1_65, %c1_66, %c0_67, %c0_68] : memref<2x3x72x64xbf16, #tpu.memory_space<vmem>>, vector<1x1x72x64xbf16>
    %49 = vector.shape_cast %48 : vector<1x1x72x64xbf16> to vector<72x64xbf16>
    %cst_69 = arith.constant dense<0.000000e+00> : vector<16x64xf32>
    %50 = tpu.matmul %47, %49, %cst_69 {dimension_numbers = #tpu.dot_dimension_numbers<[1], [0], [0], [1], [0, 0, 1, 1], [], []>} : vector<16x72xbf16>, vector<72x64xbf16>, vector<16x64xf32> -> vector<16x64xf32>
    %51 = arith.addf %46, %50 : vector<16x64xf32>
    %c2 = arith.constant 2 : index
    %c0_70 = arith.constant 0 : index
    %52 = vector.load %arg11[%c2, %c0_70] : memref<18x72xbf16, #tpu.memory_space<vmem>>, vector<16x72xbf16>
    %c0_71 = arith.constant 0 : index
    %c2_72 = arith.constant 2 : index
    %c0_73 = arith.constant 0 : index
    %c0_74 = arith.constant 0 : index
    %53 = vector.load %arg3[%c0_71, %c2_72, %c0_73, %c0_74] : memref<2x3x72x64xbf16, #tpu.memory_space<vmem>>, vector<1x1x72x64xbf16>
    %54 = vector.shape_cast %53 : vector<1x1x72x64xbf16> to vector<72x64xbf16>
    %cst_75 = arith.constant dense<0.000000e+00> : vector<16x64xf32>
    %55 = tpu.matmul %52, %54, %cst_75 {dimension_numbers = #tpu.dot_dimension_numbers<[1], [0], [0], [1], [0, 0, 1, 1], [], []>} : vector<16x72xbf16>, vector<72x64xbf16>, vector<16x64xf32> -> vector<16x64xf32>
    %56 = arith.addf %51, %55 : vector<16x64xf32>
    %c2_76 = arith.constant 2 : index
    %c0_77 = arith.constant 0 : index
    %57 = vector.load %arg10[%c2_76, %c0_77] : memref<18x72xbf16, #tpu.memory_space<vmem>>, vector<16x72xbf16>
    %c1_78 = arith.constant 1 : index
    %c2_79 = arith.constant 2 : index
    %c0_80 = arith.constant 0 : index
    %c0_81 = arith.constant 0 : index
    %58 = vector.load %arg3[%c1_78, %c2_79, %c0_80, %c0_81] : memref<2x3x72x64xbf16, #tpu.memory_space<vmem>>, vector<1x1x72x64xbf16>
    %59 = vector.shape_cast %58 : vector<1x1x72x64xbf16> to vector<72x64xbf16>
    %cst_82 = arith.constant dense<0.000000e+00> : vector<16x64xf32>
    %60 = tpu.matmul %57, %59, %cst_82 {dimension_numbers = #tpu.dot_dimension_numbers<[1], [0], [0], [1], [0, 0, 1, 1], [], []>} : vector<16x72xbf16>, vector<72x64xbf16>, vector<16x64xf32> -> vector<16x64xf32>
    %61 = arith.addf %56, %60 : vector<16x64xf32>
    %cst_83 = arith.constant 0.000000e+00 : f32
    %62 = vector.broadcast %cst_83 : f32 to vector<16x64xf32>
    %63 = arith.maximumf %61, %62 : vector<16x64xf32>
    %64 = arith.truncf %63 : vector<16x64xf32> to vector<16x64xbf16>
    %c1_84 = arith.constant 1 : index
    %c4_85 = arith.constant 4 : index
    %65 = vector.load %arg12[%c1_84, %c4_85] : memref<18x72xbf16, #tpu.memory_space<vmem>>, vector<16x64xbf16>
    tpu.vector_store %arg12[%c1_84, %c4_85], %64 {strides = array<i32>} : memref<18x72xbf16, #tpu.memory_space<vmem>>, vector<16x64xbf16>,
    %c0_86 = arith.constant 0 : index
    %c0_87 = arith.constant 0 : index
    %66 = vector.load %arg6[%c0_86, %c0_87] : memref<1x64xf32, #tpu.memory_space<vmem>>, vector<1x64xf32>
    %c0_88 = arith.constant 0 : index
    %c0_89 = arith.constant 0 : index
    %67 = vector.load %arg12[%c0_88, %c0_89] : memref<18x72xbf16, #tpu.memory_space<vmem>>, vector<16x72xbf16>
    %c0_90 = arith.constant 0 : index
    %c0_91 = arith.constant 0 : index
    %c0_92 = arith.constant 0 : index
    %68 = vector.load %arg5[%c0_90, %c0_91, %c0_92] : memref<3x72x64xbf16, #tpu.memory_space<vmem>>, vector<1x72x64xbf16>
    %69 = vector.shape_cast %68 : vector<1x72x64xbf16> to vector<72x64xbf16>
    %cst_93 = arith.constant dense<0.000000e+00> : vector<16x64xf32>
    %70 = tpu.matmul %67, %69, %cst_93 {dimension_numbers = #tpu.dot_dimension_numbers<[1], [0], [0], [1], [0, 0, 1, 1], [], []>} : vector<16x72xbf16>, vector<72x64xbf16>, vector<16x64xf32> -> vector<16x64xf32>
    %71 = vector.broadcast %66 : vector<1x64xf32> to vector<16x64xf32>
    %72 = arith.addf %71, %70 : vector<16x64xf32>
    %c1_94 = arith.constant 1 : index
    %c0_95 = arith.constant 0 : index
    %73 = vector.load %arg12[%c1_94, %c0_95] : memref<18x72xbf16, #tpu.memory_space<vmem>>, vector<16x72xbf16>
    %c1_96 = arith.constant 1 : index
    %c0_97 = arith.constant 0 : index
    %c0_98 = arith.constant 0 : index
    %74 = vector.load %arg5[%c1_96, %c0_97, %c0_98] : memref<3x72x64xbf16, #tpu.memory_space<vmem>>, vector<1x72x64xbf16>
    %75 = vector.shape_cast %74 : vector<1x72x64xbf16> to vector<72x64xbf16>
    %cst_99 = arith.constant dense<0.000000e+00> : vector<16x64xf32>
    %76 = tpu.matmul %73, %75, %cst_99 {dimension_numbers = #tpu.dot_dimension_numbers<[1], [0], [0], [1], [0, 0, 1, 1], [], []>} : vector<16x72xbf16>, vector<72x64xbf16>, vector<16x64xf32> -> vector<16x64xf32>
    %77 = arith.addf %72, %76 : vector<16x64xf32>
    %c2_100 = arith.constant 2 : index
    %c0_101 = arith.constant 0 : index
    %78 = vector.load %arg12[%c2_100, %c0_101] : memref<18x72xbf16, #tpu.memory_space<vmem>>, vector<16x72xbf16>
    %c2_102 = arith.constant 2 : index
    %c0_103 = arith.constant 0 : index
    %c0_104 = arith.constant 0 : index
    %79 = vector.load %arg5[%c2_102, %c0_103, %c0_104] : memref<3x72x64xbf16, #tpu.memory_space<vmem>>, vector<1x72x64xbf16>
    %80 = vector.shape_cast %79 : vector<1x72x64xbf16> to vector<72x64xbf16>
    %cst_105 = arith.constant dense<0.000000e+00> : vector<16x64xf32>
    %81 = tpu.matmul %78, %80, %cst_105 {dimension_numbers = #tpu.dot_dimension_numbers<[1], [0], [0], [1], [0, 0, 1, 1], [], []>} : vector<16x72xbf16>, vector<72x64xbf16>, vector<16x64xf32> -> vector<16x64xf32>
    %82 = arith.addf %77, %81 : vector<16x64xf32>
    %cst_106 = arith.constant 0.000000e+00 : f32
    %83 = vector.broadcast %cst_106 : f32 to vector<16x64xf32>
    %84 = arith.maximumf %82, %83 : vector<16x64xf32>
    %85 = arith.truncf %84 : vector<16x64xf32> to vector<16x64xbf16>
    %c0_107 = arith.constant 0 : index
    %c0_108 = arith.constant 0 : index
    %86 = vector.load %arg7[%c0_107, %c0_108] : memref<64x256xbf16, #tpu.memory_space<vmem>>, vector<64x256xbf16>
    %cst_109 = arith.constant dense<0.000000e+00> : vector<16x256xf32>
    %87 = tpu.matmul %85, %86, %cst_109 {dimension_numbers = #tpu.dot_dimension_numbers<[1], [0], [0], [1], [0, 0, 1, 1], [], []>} : vector<16x64xbf16>, vector<64x256xbf16>, vector<16x256xf32> -> vector<16x256xf32>
    %c0_110 = arith.constant 0 : index
    %c0_111 = arith.constant 0 : index
    %88 = vector.load %arg8[%c0_110, %c0_111] : memref<1x256xf32, #tpu.memory_space<vmem>>, vector<1x256xf32>
    %89 = vector.broadcast %88 : vector<1x256xf32> to vector<16x256xf32>
    %90 = arith.addf %87, %89 : vector<16x256xf32>
    %cst_112 = arith.constant 0.000000e+00 : f32
    %91 = vector.broadcast %cst_112 : f32 to vector<16x256xf32>
    %92 = arith.maximumf %90, %91 : vector<16x256xf32>
    %93 = arith.truncf %92 : vector<16x256xf32> to vector<16x256xbf16>
    %c0_113 = arith.constant 0 : index
    %c0_114 = arith.constant 0 : index
    %c0_115 = arith.constant 0 : index
    %94 = vector.load %arg9[%c0_113, %c0_114, %c0_115] : memref<1x16x256xbf16, #tpu.memory_space<vmem>>, vector<1x16x256xbf16>
    %95 = vector.shape_cast %94 : vector<1x16x256xbf16> to vector<16x256xbf16>
    %96 = vector.shape_cast %93 : vector<16x256xbf16> to vector<1x16x256xbf16>
    tpu.vector_store %arg9[%c0_113, %c0_114, %c0_115], %96 {strides = array<i32>} : memref<1x16x256xbf16, #tpu.memory_space<vmem>>, vector<1x16x256xbf16>,
    return
  }
  func.func @transform_0(%arg0: i32) -> (i32, i32, i32) {
    %c0_i32 = arith.constant 0 : i32
    %c0_i32_0 = arith.constant 0 : i32
    %c0_i32_1 = arith.constant 0 : i32
    return %arg0, %c0_i32, %c0_i32_0 : i32, i32, i32
  }
  func.func @transform_1(%arg0: i32) -> (i32, i32, i32) {
    %c0_i32 = arith.constant 0 : i32
    %c0_i32_0 = arith.constant 0 : i32
    %c0_i32_1 = arith.constant 0 : i32
    return %arg0, %c0_i32, %c0_i32_0 : i32, i32, i32
  }
  func.func @transform_2(%arg0: i32) -> (i32, i32, i32, i32) {
    %c0_i32 = arith.constant 0 : i32
    %c0_i32_0 = arith.constant 0 : i32
    %c0_i32_1 = arith.constant 0 : i32
    %c0_i32_2 = arith.constant 0 : i32
    %c0_i32_3 = arith.constant 0 : i32
    return %c0_i32, %c0_i32_0, %c0_i32_1, %c0_i32_2 : i32, i32, i32, i32
  }
  func.func @transform_3(%arg0: i32) -> (i32, i32) {
    %c0_i32 = arith.constant 0 : i32
    %c0_i32_0 = arith.constant 0 : i32
    %c0_i32_1 = arith.constant 0 : i32
    return %c0_i32, %c0_i32_0 : i32, i32
  }
  func.func @transform_4(%arg0: i32) -> (i32, i32, i32) {
    %c0_i32 = arith.constant 0 : i32
    %c0_i32_0 = arith.constant 0 : i32
    %c0_i32_1 = arith.constant 0 : i32
    %c0_i32_2 = arith.constant 0 : i32
    return %c0_i32, %c0_i32_0, %c0_i32_1 : i32, i32, i32
  }
  func.func @transform_5(%arg0: i32) -> (i32, i32) {
    %c0_i32 = arith.constant 0 : i32
    %c0_i32_0 = arith.constant 0 : i32
    %c0_i32_1 = arith.constant 0 : i32
    return %c0_i32, %c0_i32_0 : i32, i32
  }
  func.func @transform_6(%arg0: i32) -> (i32, i32) {
    %c0_i32 = arith.constant 0 : i32
    %c0_i32_0 = arith.constant 0 : i32
    %c0_i32_1 = arith.constant 0 : i32
    return %c0_i32, %c0_i32_0 : i32, i32
  }
  func.func @transform_7(%arg0: i32) -> (i32, i32) {
    %c0_i32 = arith.constant 0 : i32
    %c0_i32_0 = arith.constant 0 : i32
    %c0_i32_1 = arith.constant 0 : i32
    return %c0_i32, %c0_i32_0 : i32, i32
  }
  func.func @transform_8(%arg0: i32) -> (i32, i32, i32) {
    %c0_i32 = arith.constant 0 : i32
    %c0_i32_0 = arith.constant 0 : i32
    %c0_i32_1 = arith.constant 0 : i32
    return %arg0, %c0_i32, %c0_i32_0 : i32, i32, i32
  }
}

</mosaic_0001>

<bundles_post_ra>
// kernel: tpu_custom_call.1
= control target key start
LH: loop header
LB: loop body
LE: loop exit
PB: predicated region body
PF: predicated region fallthrough
CT: control target
= control target key end

     0   :  { %13 = vsyncpa [#allocation6], 0  ;;  %s2233_s0 = inlined_call_operand.vmem [shape: bf16[2,16,64], index: 0, kind: input, shape index: {}]   ;;  %s2234_s1 = inlined_call_operand.vmem [shape: bf16[2,16,64], index: 1, kind: input, shape index: {}]   ;;  %s2235_s2 = inlined_call_operand.vmem [shape: bf16[2,3,72,64], index: 2, kind: input, shape index: {}]   ;;  %s2236_s3 = inlined_call_operand.vmem [shape: f32[1,64], index: 3, kind: input, shape index: {}]   ;;  %s2237_s4 = inlined_call_operand.vmem [shape: bf16[3,72,64], index: 4, kind: input, shape index: {}]   ;;  %s2238_s5 = inlined_call_operand.vmem [shape: f32[1,64], index: 5, kind: input, shape index: {}]   ;;  %s2239_s6 = inlined_call_operand.vmem [shape: bf16[64,256], index: 6, kind: input, shape index: {}]   ;;  %s2240_s7 = inlined_call_operand.vmem [shape: f32[1,256], index: 7, kind: input, shape index: {}]   ;;  %s2241_s8 = inlined_call_operand.hbm [shape: bf16[2,16,256], index: 8, kind: output, shape index: {}]  }
   0x1   :  { %15 = vsyncpa [#allocation6 + $0x1], 0  ;;  %s1828_s27 = smov 0   ;;  %s1830_s28 = smov 0  }
   0x2   :  { %s1832_s29 = smov 0   ;;  %s1834_s30 = smov 0  }
   0x3 LB: > { %s1849_s9 = sadd.s32 4294967295, %s1777_s30   ;;  %s1323_s10 = sadd.s32 4294967294, %s1777_s30   ;;  %s1777_s30 = sphi %s1834_s30, %s2257_s30   ;;  %s1773_s29 = sphi %s1832_s29, %s2256_s29   ;;  %s1769_s28 = sphi %s1830_s28, %s2255_s28   ;;  %s1765_s27 = sphi %s1828_s27, %s2254_s27  }
   0x4   : > { %s1853_s11 = sadd.s32 1, %s1777_s30   ;;  %s206_s12 = sadd.s32 1, %s1773_s29 }
   0x5   : > { %s203_s13 = ssub.s32 %s1777_s30, %s1853_s11  ;;  %p216_p0 = scmp.ne.s32.totalorder %s1773_s29, %s1769_s28 }
   0x6   : > { %p204_p1 = scmp.eq.s32.totalorder %s203_s13, 0  ;;  %p217_p2 = scmp.eq.s32.totalorder %s1849_s9, 1 }
   0x7   : > { %p222_p3 = scmp.ne.s32.totalorder %s1769_s28, %s1765_s27  ;;  %p223_p4 = scmp.eq.s32.totalorder %s1323_s10, 1 }
   0x8   : > { %s1864_s14 = scalar_select %p204_p1, %s1773_s29, %s206_s12  }
   0x9   : > { %p1866_p5 = por %p217_p2, %p216_p0  ;;  %p1870_p6 = por %p223_p4, %p222_p3 }
   0xa   : > { %p1326_p7 = scmp.ge.s32.totalorder %s1777_s30, 1  ;;  %p275_p8 = scmp.lt.s32.totalorder %s1777_s30, 3 }
   0xc   : > { %p276_p9 = pnand %p1326_p7, %p275_p8 }
   0xd   : > { %p314_p10 = scmp.lt.s32.totalorder (!%p276_p9), %s1849_s9, 1  ;;  %s1780_s10 = smov (!%p276_p9), 4  }
   0xe   : > { %279 = sbr.rel (%p276_p9) target bundleno = 761 (0x2f9), region = 52  ;;  %s311_s13 = sand.u32 (!%p276_p9), 1, %s1769_s28  }
   0xf   : > { %s1327_s17 = sshll.u32 (!%p276_p9), %s311_s13, 4  ;;  %s1648_s18 = sshll.u32 (!%p276_p9), %s1849_s9, 4 }
  0x10   : > { %s1245_s21 = scalar_lea.hbm (!%p276_p9), %s2241_s8, %s1648_s18 }
  0x13   : > { %vm326_vm0 = vsmask.f32 256  ;;  %v1361_v0 = vld [vmem:[%s2235_s2 + $0x8c] sm:$0xf]  ;;  %vm325_vm1 = vcmask 581632   ;;  %s315_s19 = scalar_select %p314_p10, %s1849_s9, 1 }
  0x14   : > { %v328_v1 = vld [vmem:[#allocation2] sm:$0x1]  ;;  %v552_v2 = vunpack.c.l.b16 %v1361_v0  ;;  %vm1882_vm2 = vmand %vm325_vm1, %vm326_vm0  ;;  %vm331_vm3 = vsmask.f32 7938  ;;  %v333_v4 = vld [vmem:[#allocation2 + $0x8] sm:$0x1] }
  0x15   : > { %vm495_vm4 = vcmask 1043456   ;;  %v329_v5 = vsel %vm1882_vm2, 0, %v328_v1  ;;  %vm1889_vm5 = vmand %vm325_vm1, %vm331_vm3  ;;  %vm336_vm6 = vcmask 27648   ;;  %v346_v7 = vld [vmem:[#allocation3] sm:$0x1]  ;;  %s1599_s20 = sshll.u32 %s315_s19, 3 }
  0x16   : > { %330 = vst [vmem:[#allocation2] sm:$0x1] %v329_v5  ;;  %v334_v8 = vsel %vm1889_vm5, 0, %v333_v4  ;;  %vm339_vm7 = vcmask 24576   ;;  %s323_s23 = scalar_lea.vmem %s2234_s1, %s1599_s20  ;;  %s318_s26 = scalar_lea.vmem %s2233_s0, %s1599_s20  ;;  %v557_v9 = vpack.c.b16 %v552_v2, %v552_v2  ;;  %vm341_vm8 = vcmask 585248   ;;  %v1610_v46 = vld [vmem:[%s2235_s2 + $0x84] sm:$0xff] }
  0x17   : > { %335 = vst [vmem:[#allocation2 + $0x8] sm:$0x1] %v334_v8  ;;  %v347_v10 = vsel %vm1882_vm2, 0, %v346_v7  ;;  %v349_v11 = vld [vmem:[#allocation3 + $0x8] sm:$0x1]  ;;  %v1779_v23 = vmov 0  }
  0x18   : > { %v413_v12 = vld [vmem:[%s323_s23 + $0x4] sm:$0xf]  ;;  %v370_v14 = vld [vmem:[%s318_s26] sm:$0xf]  ;;  %v358_v18 = vld [vmem:[#allocation4] sm:$0x1] }
  0x19   : > { %v371_v13 = vld [vmem:[%s318_s26 + $0x4] sm:$0xf]  ;;  %v423_v15 = vshrl.u32 %v413_v12, 16  ;;  %v412_v17 = vld [vmem:[%s323_s23] sm:$0xf]  ;;  %v426_v19 = vshll.u32 %v413_v12, 16 }
  0x1a   : > { %v383_v16 = vshrl.u32 %v371_v13, 16  ;;  %v375_v20 = vshrl.u32 %v370_v14, 16  ;;  %v378_v21 = vshll.u32 %v370_v14, 16  ;;  %v415_v22 = vshrl.u32 %v412_v17, 16  ;;  %337 = vst.msk [vmem:[#allocation2] sm:$0xf] %vm336_vm6, %v1779_v23 }
  0x1b   : > { %v425_v24 = vrot.slane %v423_v15, 7  ;;  %v566_v26 = vsel %vm495_vm4, %v557_v9, 0  ;;  %340 = vst.msk [vmem:[#allocation2 + $0x8] sm:$0x1] %vm339_vm7, %v1779_v23  ;;  %v350_v27 = vsel %vm1889_vm5, 0, %v349_v11  ;;  %v386_v28 = vshll.u32 %v371_v13, 16 }
  0x1c   : > { %v385_v25 = vrot.slane %v383_v16, 7  ;;  %v377_v29 = vrot.slane %v375_v20, 7  ;;  %v417_v30 = vrot.slane %v415_v22, 7  ;;  %571 = vmatpush.bf16.msra.mxu1 %v566_v26  ;;  %342 = vst.msk [vmem:[#allocation2] sm:$0xf] %vm341_vm8, %v1779_v23  ;;  %v359_v31 = vsel %vm1882_vm2, 0, %v358_v18 }
  0x1d   : > { %v430_v32 = vrot.slane %v425_v24, 4  ;;  %348 = vst [vmem:[#allocation3] sm:$0x1] %v347_v10  ;;  %v361_v34 = vld [vmem:[#allocation4 + $0x8] sm:$0x1]  ;;  %v418_v36 = vshll.u32 %v412_v17, 16  ;;  %v428_v38 = vor.u32 %v426_v19, %v425_v24 }
  0x1e   : > { %v390_v33 = vrot.slane %v385_v25, 4  ;;  %v380_v35 = vor.u32 %v378_v21, %v377_v29  ;;  %vm372_vm9 = vsmask.f32 4368  ;;  %351 = vst [vmem:[#allocation3 + $0x8] sm:$0x1] %v350_v27  ;;  %v362_v37 = vsel %vm1889_vm5, 0, %v361_v34 }
  0x1f   : > { %435 = vrot.lane.b32.xlu0 %v430_v32, %s1780_s10  ;;  %354 = vst.msk [vmem:[#allocation3 + $0x8] sm:$0x1] %vm339_vm7, %v1779_v23  ;;  %v421_v39 = vrot.slane %v417_v30, 4  ;;  %v388_v40 = vor.u32 %v386_v28, %v385_v25  ;;  %v381_v41 = vrot.slane %v377_v29, 4  ;;  %vm1922_vm10 = vmor %vm326_vm0, %vm372_vm9  ;;  %v420_v43 = vor.u32 %v418_v36, %v417_v30  ;;  %v1609_v47 = vld [vmem:[%s2235_s2 + $0x7c] sm:$0xff]  ;;  %v1608_v48 = vld [vmem:[%s2235_s2 + $0x74] sm:$0xff] }
  0x20   : > { %395 = vrot.lane.b32.xlu1 %v390_v33, %s1780_s10  ;;  %391 = vrot.lane.b32.xlu2 %v380_v35, %s1780_s10  ;;  %360 = vst [vmem:[#allocation4] sm:$0x1] %v359_v31  ;;  %v1469_v49 = vld [vmem:[%s2235_s2 + $0xd4] sm:$0xf]  ;;  %vm344_vm11 = vcmask 582176   ;;  %v1607_v55 = vld [vmem:[%s2235_s2 + $0x6c] sm:$0xff] }
  0x21   : > { %363 = vst [vmem:[#allocation4 + $0x8] sm:$0x1] %v362_v37  ;;  %v429_v44 = vsel %vm1922_vm10, %v421_v39, %v428_v38  ;;  %v389_v45 = vsel %vm1922_vm10, %v381_v41, %v388_v40  ;;  %572 = vmatpush.bf16.msra.mxu1 %v1610_v46  ;;  %v850_v50 = vunpack.c.l.b16 %v1469_v49  ;;  %v458_v51 = vld [vmem:[%s2235_s2 + $0x20] sm:$0xf]  ;;  %v1417_v52 = vld [vmem:[%s2235_s2 + $0xb0] sm:$0xf] }
  0x22   : > { %366 = vst.msk [vmem:[#allocation4 + $0x8] sm:$0x1] %vm339_vm7, %v1779_v23  ;;  %v481_v53 = vunpack.c.l.b16 %v458_v51  ;;  %v717_v54 = vunpack.c.l.b16 %v1417_v52  ;;  %v1626_v62 = vld [vmem:[%s2235_s2 + $0xcc] sm:$0xff]  ;;  %v1391_v63 = vld [vmem:[%s2235_s2 + $0x44] sm:$0xf]  ;;  %v1605_v0 = vld [vmem:[%s2235_s2 + $0x18] sm:$0xff] }
  0x23   : > { %338 = vst.msk [vmem:[#allocation2 + $0x4] sm:$0xf] %vm336_vm6, %v1779_v23  ;;  %v855_v56 = vpack.c.b16 %v850_v50, %v850_v50  ;;  %v635_v1 = vunpack.c.l.b16 %v1391_v63  ;;  %v1618_v2 = vld [vmem:[%s2235_s2 + $0xa8] sm:$0xff]  ;;  %vm400_vm12 = vcmask 551968   ;;  %v1604_v5 = vld [vmem:[%s2235_s2 + $0x10] sm:$0xff]  ;;  %v1617_v6 = vld [vmem:[%s2235_s2 + $0xa0] sm:$0xff] }
  0x24   : > { %352 = vst.msk [vmem:[#allocation3] sm:$0xf] %vm336_vm6, %v1779_v23  ;;  %v486_v57 = vpack.c.b16 %v481_v53, %v481_v53  ;;  %v722_v58 = vpack.c.b16 %v717_v54, %v717_v54  ;;  %v1625_v3 = vld [vmem:[%s2235_s2 + $0xc4] sm:$0xff]  ;;  %vm2006_vm13 = vmand %vm400_vm12, %vm331_vm3  ;;  %v402_v9 = vld [vmem:[#allocation2] sm:$0xf]  ;;  %vm491_vm14 = vcmask 588800  }
  0x25   : > { %353 = vst.msk [vmem:[#allocation3 + $0x4] sm:$0xf] %vm336_vm6, %v1779_v23  ;;  %573 = vmatpush.bf16.msra.mxu1 %v1609_v47  ;;  %v864_v59 = vsel %vm495_vm4, %v855_v56, 0  ;;  %v640_v4 = vpack.c.b16 %v635_v1, %v635_v1  ;;  %v1614_v11 = vld [vmem:[%s2235_s2 + $0x3c] sm:$0xff]  ;;  %v1603_v14 = vld [vmem:[%s2235_s2 + $0x8] sm:$0xff]  ;;  %v1613_v16 = vld [vmem:[%s2235_s2 + $0x34] sm:$0xff] }
  0x26   : > { %364 = vst.msk [vmem:[#allocation4] sm:$0xf] %vm336_vm6, %v1779_v23  ;;  %v497_v60 = vsel %vm495_vm4, %v486_v57, 0  ;;  %v731_v61 = vsel %vm495_vm4, %v722_v58, 0  ;;  %v1624_v12 = vld [vmem:[%s2235_s2 + $0xbc] sm:$0xff]  ;;  %v1623_v17 = vld [vmem:[%s2235_s2 + $0xb4] sm:$0xff] }
  0x27   : > { %431 = vrot.lane.b32.xlu0 %v420_v43, %s1780_s10  ;;  %365 = vst.msk [vmem:[#allocation4 + $0x4] sm:$0xf] %vm336_vm6, %v1779_v23  ;;  %502 = vmatpush.bf16.msra.mxu0 %v497_v60  ;;  %v649_v7 = vsel %vm495_vm4, %v640_v4, 0  ;;  %v1616_v15 = vld [vmem:[%s2235_s2 + $0x98] sm:$0xff]  ;;  %v1602_v18 = vld [vmem:[%s2235_s2] sm:$0xff]  ;;  %v1615_v20 = vld [vmem:[%s2235_s2 + $0x90] sm:$0xff] }
  0x28   : > { %433 = vrot.lane.b32.xlu1 %v429_v44, %s1780_s10  ;;  %393 = vrot.lane.b32.xlu2 %v389_v45, %s1780_s10  ;;  %343 = vst.msk [vmem:[#allocation2 + $0x4] sm:$0xf] %vm341_vm8, %v1779_v23  ;;  %v1443_v19 = vld [vmem:[%s2235_s2 + $0x68] sm:$0xf]  ;;  %v1612_v25 = vld [vmem:[%s2235_s2 + $0x2c] sm:$0xff]  ;;  %vm407_vm15 = vcmask 548896  }
  0x29   : > { %355 = vst.msk [vmem:[#allocation3] sm:$0xf] %vm341_vm8, %v1779_v23  ;;  %574 = vmatpush.bf16.msra.mxu1 %v1608_v48  ;;  %736 = vmatpush.bf16.msra.mxu3 %v731_v61  ;;  %v784_v21 = vunpack.c.l.b16 %v1443_v19  ;;  %v1622_v26 = vld [vmem:[%s2235_s2 + $0x60] sm:$0xff]  ;;  %v1621_v28 = vld [vmem:[%s2235_s2 + $0x58] sm:$0xff]  ;;  %v1620_v30 = vld [vmem:[%s2235_s2 + $0x50] sm:$0xff]  ;;  %vm1193_vm3 = vcmask 523264  }
  0x2a   : > { %356 = vst.msk [vmem:[#allocation3 + $0x4] sm:$0xf] %vm341_vm8, %v1779_v23  ;;  %654 = vmatpush.bf16.msra.mxu2 %v649_v7  ;;  %v1611_v27 = vld [vmem:[%s2235_s2 + $0x24] sm:$0xff]  ;;  %vm2058_vm1 = vmand %vm407_vm15, %vm326_vm0  ;;  %vm763_vm0 = vcmask 1046528   ;;  %vm605_vm2 = vsmask.f32 7424 }
  0x2b   : > { %367 = vst.msk [vmem:[#allocation4] sm:$0xf] %vm341_vm8, %v1779_v23  ;;  %503 = vmatpush.bf16.msra.mxu0 %v1605_v0  ;;  %v789_v22 = vpack.c.b16 %v784_v21, %v784_v21  ;;  %v1619_v34 = vld [vmem:[%s2235_s2 + $0x48] sm:$0xff]  ;;  %v1630_v42 = vld [vmem:[%s2237_s4 + $0x10] sm:$0xff]  ;;  %s313_s19 = scalar_lea.vmem [#allocation5], %s1327_s17  ;;  %s1248_s23 = sshll.u32 %s1245_s21, 4  ;;  %s1249_s23 = int_to_ptr.hbm [resolvable:$true] %s1248_s23 }
  0x2c   : > { %368 = vst.msk [vmem:[#allocation4 + $0x4] sm:$0xf] %vm341_vm8, %v1779_v23  ;;  %s1246_s22 = sshll.u32 %s313_s19, 4  ;;  %s1234_s9 = scalar_lea.sflag [#allocation6], %s311_s13  ;;  %s1247_s22 = int_to_ptr.vmem [resolvable:$true] %s1246_s22 }
  0x2d   : > { %357 = vst.msk [vmem:[#allocation3 + $0x8] sm:$0x1] %vm344_vm11, %v1779_v23  ;;  %575 = vmatpush.bf16.msra.mxu1 %v1607_v55  ;;  %737 = vmatpush.bf16.msra.mxu3 %v1618_v2  ;;  %v798_v24 = vsel %vm495_vm4, %v789_v22, 0  ;;  %s1729_s24 = sshra.s32 %s1249_s23, 4  ;;  %s1735_s17 = scalar_lea.hbm %s2241_s8, 32  ;;  %s1730_s24 = int_to_ptr.hbm [resolvable:$true] %s1729_s24 }
  0x2e   : > { %345 = vst.msk [vmem:[#allocation2 + $0x8] sm:$0x1] %vm344_vm11, %v1779_v23  ;;  %655 = vmatpush.bf16.msra.mxu2 %v1614_v11  ;;  %s1731_s25 = scalar_lea.hbm %s1730_s24, 16  ;;  %p1736_p0 = scmp.lt.s32.totalorder %s1730_s24, %s2241_s8 }
  0x2f   : > { %369 = vst.msk [vmem:[#allocation4 + $0x8] sm:$0x1] %vm344_vm11, %v1779_v23  ;;  %504 = vmatpush.bf16.msra.mxu0 %v1604_v5  ;;  %p1732_p11 = scmp.ne.s32.totalorder %s1730_s24, %s1731_s25  ;;  %p1737_p1 = scmp.lt.s32.totalorder %s1735_s17, %s1731_s25 }
  0x30   : > { %v440_v40 = vld [vmem:[#allocation3] sm:$0xf] }
  0x31   : > { %869 = vmatpush.bf16.msrb.mxu1 %v864_v59  ;;  %738 = vmatpush.bf16.msra.mxu3 %v1617_v6  ;;  %p1733_p12 = pnand %p1732_p11, %p1866_p5  ;;  %p1738_p2 = por %p1737_p1, %p1736_p0 }
  0x32   : > { %656 = vmatpush.bf16.msra.mxu2 %v1613_v16 }
  0x33   : > { %505 = vmatpush.bf16.msra.mxu0 %v1603_v14  ;;  %p1734_p13 = pneg %p1733_p12 }
  0x34   : > { %v444_v32 = vld [vmem:[#allocation3 + $0x8] sm:$0x1] }
  0x35   : > { %870 = vmatpush.bf16.msrb.mxu1 %v1626_v62  ;;  %739 = vmatpush.bf16.msra.mxu3 %v1616_v15  ;;  %v409_v33 = vld [vmem:[#allocation2 + $0x8] sm:$0x1]  ;;  %p1739_p3 = pnand %p1738_p2, %p1734_p13 }
  0x36   : > { %657 = vmatpush.bf16.msra.mxu2 %v1612_v25 }
  0x37   : > { %506 = vmatpush.bf16.msra.mxu0 %v1602_v18  ;;  %v1713_v18 = vld [vmem:[%s2236_s3] ss:$0 sm:$0xff] }
  0x39   : > { %871 = vmatpush.bf16.msrb.mxu1 %v1625_v3  ;;  %740 = vmatpush.bf16.msra.mxu3 %v1615_v20 }
  0x3a   : > { %658 = vmatpush.bf16.msra.mxu2 %v1611_v27 }
  0x3b   : > { %803 = vmatpush.bf16.msrb.mxu0 %v798_v24 }
  0x3d   : > { %872 = vmatpush.bf16.msrb.mxu1 %v1624_v12 }
  0x3f   : > { %804 = vmatpush.bf16.msrb.mxu0 %v1622_v26 }
  0x41   : > { %873 = vmatpush.bf16.msrb.mxu1 %v1623_v17 }
  0x43   : > { %805 = vmatpush.bf16.msrb.mxu0 %v1621_v28 }
  0x47   : > { %806 = vmatpush.bf16.msrb.mxu0 %v1620_v30 }
  0x4b   : > { %807 = vmatpush.bf16.msrb.mxu0 %v1619_v34 }
  0x7a   : > { %v392_v10 = vpop.permute.xlu2 %391 }
  0x7b   : > { %v403_v13 = vsel %vm2006_vm13, %v392_v10, %v402_v9 }
  0x7c   : > { %404 = vst [vmem:[#allocation2] sm:$0xf] %v403_v13 }
  0x82   : > { %v394_v23 = vpop.permute.xlu2 %393 }
  0x83   : > { %406 = vst.msk [vmem:[#allocation2 + $0x4] sm:$0xf] %vm400_vm12, %v394_v23  ;;  %v1665_v43 = vld [vmem:[#allocation2] sm:$0xe] }
  0x8a   : > { %v1606_v29 = vld [vmem:[#allocation2] sm:$0xff] }
  0x8b   : > { %1382 = vmatmul.msk.bf16.vlgmr.msra.gmra.mxu1 %vm491_vm14, %v1606_v29  ;;  %v1654_v39 = vld [vmem:[#allocation2] sm:$0xff]  }
  0x8c   : > { %v1664_v41 = vld [vmem:[#allocation2] sm:$0xf0]  ;;  %v691_v44 = vshll.u32 %v1654_v39, 16  ;;  %v689_v53 = vshrl.u32 %v1654_v39, 16 }
  0x8d   : > { %v1666_v48 = vor.u32 %v1665_v43, %v1664_v41 }
  0x8e   : > { %v693_v54 = vrot.slane %v691_v44, 1 }
  0x8f   : > { %v830_v56 = vrot.slane %v1666_v48, 1 }
  0x90   : > { %v694_v59 = vor.u32 %v693_v54, %v689_v53 }
  0x91   : > { %v436_v35 = vpop.permute.xlu0 %435 }
  0x92   : > { %v396_v36 = vpop.permute.xlu1 %395  ;;  %v445_v37 = vsel %vm2058_vm1, %v436_v35, %v444_v32 }
  0x93   : > { %v410_v38 = vsel %vm2058_vm1, %v396_v36, %v409_v33  ;;  %446 = vst [vmem:[#allocation3 + $0x8] sm:$0x1] %v445_v37 }
  0x94   : > { %411 = vst [vmem:[#allocation2 + $0x8] sm:$0x1] %v410_v38 }
  0x99   : > { %v432_v45 = vpop.permute.xlu0 %431 }
  0x9a   : > { %v434_v46 = vpop.permute.xlu1 %433  ;;  %v441_v47 = vsel %vm2006_vm13, %v432_v45, %v440_v40  ;;  %v586_v49 = vld [vmem:[#allocation3 + $0x8] sm:$0x1] }
  0x9b   : > { %443 = vst.msk [vmem:[#allocation3 + $0x4] sm:$0xf] %vm400_vm12, %v434_v46  ;;  %v669_v50 = vld [vmem:[#allocation2 + $0x8] sm:$0x1]  ;;  %v602_v51 = vunpack.c.l.b16 %v586_v49 }
  0x9c   : > { %442 = vst [vmem:[#allocation3] sm:$0xf] %v441_v47  ;;  %v685_v52 = vunpack.c.l.b16 %v669_v50 }
  0x9d   : > { %v604_v57 = vpack.c.b16 %v602_v51, %v602_v51 }
  0x9e   : > { %v687_v55 = vpack.c.b16 %v685_v52, %v685_v52 }
  0x9f   : > { %v614_v2 = vshll.u32 %v604_v57, 16  ;;  %v765_v14 = vrot.slane %v604_v57, 1 }
  0xa0   : > { %v831_v58 = vrot.slane %v687_v55, 1  ;;  %v696_v60 = vshll.u32 %v687_v55, 16 }
  0xa1   : > { %v616_v7 = vrot.slane %v614_v2, 1  ;;  %v1516_v2 = vld [vmem:[%s2237_s4 + $0x44] sm:$0xf] }
  0xa2   : > { %v832_v61 = vsel %vm763_vm0, %v830_v56, %v831_v58  ;;  %v698_v62 = vrot.slane %v696_v60, 1  ;;  %v1661_v9 = vld [vmem:[#allocation3] sm:$0xf0]  ;;  %v930_v58 = vld [vmem:[%s2237_s4 + $0x20] sm:$0xf] }
  0xa3   : > { %v1601_v63 = vld [vmem:[#allocation3] sm:$0xff]  ;;  %1486 = vmatmul.msk.bf16.vlgmr.msrb.gmra.mxu1 %vm491_vm14, %v832_v61 }
  0xa4   : > { %v1650_v0 = vld [vmem:[#allocation3] sm:$0xff]   ;;  %v699_v3 = vsel %vm605_vm2, %v694_v59, %v698_v62  ;;  %1352 = vmatmul.msk.bf16.vlgmr.msra.gmra.mxu0 %vm491_vm14, %v1601_v63  ;;  %v953_v59 = vunpack.c.l.b16 %v930_v58  ;;  %v1631_v62 = vld [vmem:[%s2237_s4 + $0x18] sm:$0xff]  ;;  %v1542_v63 = vld [vmem:[%s2237_s4 + $0x68] sm:$0xf] }
  0xa5   : > { %v609_v1 = vshll.u32 %v1650_v0, 16  ;;  %1434 = vmatmul.msk.bf16.vlgmr.msra.gmra.mxu3 %vm491_vm14, %v699_v3  ;;  %v607_v4 = vshrl.u32 %v1650_v0, 16  ;;  %v1662_v10 = vld [vmem:[#allocation3] sm:$0xe]  ;;  %v1038_v3 = vunpack.c.l.b16 %v1516_v2 }
  0xa6   : > { %v1663_v12 = vor.u32 %v1662_v10, %v1661_v9  ;;  %v958_v60 = vpack.c.b16 %v953_v59, %v953_v59  ;;  %v1629_v0 = vld [vmem:[%s2237_s4 + $0x8] sm:$0xff]  ;;  %v1628_v9 = vld [vmem:[%s2237_s4] sm:$0xff]  ;;  %v1643_v59 = vld [vmem:[%s2239_s6 + $0x14] sm:$0xf0] }
  0xa7   : > { %v611_v5 = vrot.slane %v609_v1, 1  ;;  %v1104_v1 = vunpack.c.l.b16 %v1542_v63  ;;  %v1639_v10 = vld [vmem:[%s2237_s4 + $0x60] sm:$0xff] }
  0xa8   : > { %v764_v13 = vrot.slane %v1663_v12, 1  ;;  %v967_v61 = vsel %vm495_vm4, %v958_v60, 0  ;;  %v1638_v12 = vld [vmem:[%s2237_s4 + $0x58] sm:$0xff] }
  0xa9   : > { %v612_v6 = vor.u32 %v611_v5, %v607_v4  ;;  %972 = vmatpush.bf16.msrb.mxu2 %v967_v61  ;;  %v1109_v4 = vpack.c.b16 %v1104_v1, %v1104_v1  ;;  %v1043_v5 = vpack.c.b16 %v1038_v3, %v1038_v3  ;;  %v1640_v61 = vld [vmem:[%s2239_s6 + $0x4] sm:$0xf]  ;;  %v1714_v3 = vld [vmem:[%s2238_s5] ss:$0 sm:$0xff] }
  0xaa   : > { %v766_v15 = vsel %vm763_vm0, %v764_v13, %v765_v14  ;;  %v1634_v13 = vld [vmem:[%s2237_s4 + $0x34] sm:$0xff] }
  0xab   : > { %v617_v11 = vsel %vm605_vm2, %v612_v6, %v616_v7  ;;  %v1118_v6 = vsel %vm495_vm4, %v1109_v4, 0  ;;  %v1052_v7 = vsel %vm495_vm4, %v1043_v5, 0  ;;  %v1637_v14 = vld [vmem:[%s2237_s4 + $0x50] sm:$0xff] }
  0xac   : > { %1408 = vmatmul.msk.bf16.vlgmr.msra.gmra.mxu2 %vm491_vm14, %v617_v11  ;;  %1123 = vmatpush.bf16.msra.mxu0 %v1118_v6  ;;  %v1635_v11 = vld [vmem:[%s2237_s4 + $0x3c] sm:$0xff] }
  0xad   : > { %973 = vmatpush.bf16.msrb.mxu2 %v1631_v62  ;;  %1057 = vmatpush.bf16.msrb.mxu3 %v1052_v7  ;;  %v1564_v62 = vld [vmem:[%s2239_s6 + $0x8] sm:$0xf0] }
  0xae   : > { %v1567_v63 = vor.u32 %v1640_v61, %v1564_v62 }
  0xb0   : > { %1124 = vmatpush.bf16.msra.mxu0 %v1639_v10 }
  0xb1   : > { %974 = vmatpush.bf16.msrb.mxu2 %v1630_v42  ;;  %1058 = vmatpush.bf16.msrb.mxu3 %v1635_v11  ;;  %v1562_v42 = vld [vmem:[%s2239_s6] sm:$0xf] }
  0xb4   : > { %1460 = vmatmul.msk.bf16.vlgmr.msrb.gmra.mxu0 %vm491_vm14, %v766_v15 }
  0xb5   : > { %975 = vmatpush.bf16.msrb.mxu2 %v1629_v0  ;;  %1125 = vmatpush.bf16.msra.mxu0 %v1638_v12  ;;  %v1641_v0 = vld [vmem:[%s2239_s6 + $0x4] sm:$0xf0] }
  0xb6   : > { %1059 = vmatpush.bf16.msrb.mxu3 %v1634_v13  ;;  %v1563_v1 = vor.u32 %v1641_v0, %v1562_v42 }
  0xb9   : > { %976 = vmatpush.bf16.msrb.mxu2 %v1628_v9  ;;  %1126 = vmatpush.bf16.msra.mxu0 %v1637_v14 }
 0x108   : > { %v577_v16 = vpop.f32.mrf.mxu1 }
 0x110   : > { %v579_v19 = vpop.f32.mrf.mxu1 }
 0x120   : > { %v875_v28 = vpop.f32.mrf.mxu1 }
 0x121   : > { %v508_v17 = vpop.f32.mrf.mxu0 }
 0x122   : > { %v516_v20 = vadd.f32 %v1713_v18, %v508_v17  ;;  %v1636_v17 = vld [vmem:[%s2237_s4 + $0x48] sm:$0xff] }
 0x123   : > { %1127 = vmatpush.bf16.msra.mxu0 %v1636_v17 }
 0x124   : > { %v582_v22 = vadd.f32 %v577_v16, %v516_v20  ;;  %v1633_v16 = vld [vmem:[%s2237_s4 + $0x2c] sm:$0xff] }
 0x125   : > { %1060 = vmatpush.bf16.msrb.mxu3 %v1633_v16 }
 0x128   : > { %v742_v23 = vpop.f32.mrf.mxu3  ;;  %v877_v44 = vpop.f32.mrf.mxu1 }
 0x129   : > { %v510_v21 = vpop.f32.mrf.mxu0 }
 0x12a   : > { %v517_v26 = vadd.f32 %v1713_v18, %v510_v21  ;;  %v1632_v18 = vld [vmem:[%s2237_s4 + $0x24] sm:$0xff] }
 0x12b   : > { %1061 = vmatpush.bf16.msrb.mxu3 %v1632_v18 }
 0x12c   : > { %v583_v33 = vadd.f32 %v579_v19, %v517_v26  ;;  %v912_v19 = vld [vmem:[#allocation4] sm:$0xf] }
 0x12f   : > { %v660_v24 = vpop.f32.mrf.mxu2 }
 0x130   : > { %v665_v25 = vadd.f32 %v660_v24, %v582_v22  ;;  %v744_v37 = vpop.f32.mrf.mxu3  ;;  %v916_v22 = vld [vmem:[#allocation4 + $0x8] sm:$0x1] }
 0x131   : > { %v809_v29 = vpop.f32.mrf.mxu0 }
 0x132   : > { %v747_v27 = vadd.f32 %v742_v23, %v665_v25 }
 0x134   : > { %v814_v30 = vadd.f32 %v809_v29, %v747_v27 }
 0x136   : > { %v880_v32 = vadd.f32 %v875_v28, %v814_v30 }
 0x137   : > { %v662_v34 = vpop.f32.mrf.mxu2 }
 0x138   : > { %v882_v35 = vmax.f32 %v880_v32, 0.0  ;;  %v666_v36 = vadd.f32 %v662_v34, %v583_v33 }
 0x139   : > { %v811_v40 = vpop.f32.mrf.mxu0 }
 0x13a   : > { %v884_v38 = vpack.c.bf16 %v882_v35, %v882_v35  ;;  %v748_v39 = vadd.f32 %v744_v37, %v666_v36 }
 0x13c   : > { %v887_v41 = vshrl.u32 %v884_v38, 16  ;;  %v815_v43 = vadd.f32 %v811_v40, %v748_v39  ;;  %v890_v45 = vshll.u32 %v884_v38, 16 }
 0x13e   : > { %v881_v46 = vadd.f32 %v877_v44, %v815_v43  ;;  %v889_v47 = vrot.slane %v887_v41, 7  ;;  %v1646_v43 = vld [vmem:[%s2239_s6 + $0x34] sm:$0xf]  ;;  %v1588_v44 = vld [vmem:[%s2239_s6 + $0x38] sm:$0xf0] }
 0x140   : > { %v883_v48 = vmax.f32 %v881_v46, 0.0  ;;  %v892_v49 = vor.u32 %v890_v45, %v889_v47  ;;  %v893_v55 = vrot.slane %v889_v47, 4  ;;  %v1586_v45 = vld [vmem:[%s2239_s6 + $0x30] sm:$0xf]  ;;  %v1591_v46 = vor.u32 %v1646_v43, %v1588_v44  ;;  %v1647_v47 = vld [vmem:[%s2239_s6 + $0x34] sm:$0xf0] }
 0x142   : > { %v885_v50 = vpack.c.bf16 %v883_v48, %v883_v48  ;;  %903 = vrot.lane.b32.xlu1 %v892_v49, %s1780_s10  ;;  %v1587_v48 = vor.u32 %v1647_v47, %v1586_v45  ;;  %1215 = vmatpush.bf16.msra.mxu2 %v1591_v46  ;;  %v1644_v49 = vld [vmem:[%s2239_s6 + $0x24] sm:$0xf] }
 0x144   : > { %v895_v51 = vshrl.u32 %v885_v50, 16  ;;  %v898_v52 = vshll.u32 %v885_v50, 16  ;;  %1201 = vmatpush.bf16.msra.mxu1 %v1587_v48  ;;  %v1580_v50 = vld [vmem:[%s2239_s6 + $0x28] sm:$0xf0] }
 0x146   : > { %v897_v53 = vrot.slane %v895_v51, 7  ;;  %v1578_v51 = vld [vmem:[%s2239_s6 + $0x20] sm:$0xf] }
 0x148   : > { %v902_v54 = vrot.slane %v897_v53, 4  ;;  %v900_v56 = vor.u32 %v898_v52, %v897_v53  ;;  %v1583_v52 = vor.u32 %v1644_v49, %v1580_v50  ;;  %v1645_v53 = vld [vmem:[%s2239_s6 + $0x24] sm:$0xf0] }
 0x14a   : > { %907 = vrot.lane.b32.xlu0 %v902_v54, %s1780_s10  ;;  %v901_v57 = vsel %vm1922_vm10, %v893_v55, %v900_v56  ;;  %v1579_v54 = vor.u32 %v1645_v53, %v1578_v51  ;;  %1216 = vmatpush.bf16.msra.mxu2 %v1583_v52  ;;  %v1642_v55 = vld [vmem:[%s2239_s6 + $0x14] sm:$0xf]  ;;  %v1572_v56 = vld [vmem:[%s2239_s6 + $0x18] sm:$0xf0] }
 0x14b   : > { %905 = vrot.lane.b32.xlu2 %v901_v57, %s1780_s10  ;;  %v1570_v57 = vld [vmem:[%s2239_s6 + $0x10] sm:$0xf]  ;;  %v1575_v58 = vor.u32 %v1642_v55, %v1572_v56 }
 0x14c   : > { %1202 = vmatpush.bf16.msra.mxu1 %v1579_v54  ;;  %v1571_v60 = vor.u32 %v1643_v59, %v1570_v57 }
 0x14e   : > { %1217 = vmatpush.bf16.msra.mxu2 %v1575_v58 }
 0x150   : > { %1203 = vmatpush.bf16.msra.mxu1 %v1571_v60 }
 0x152   : > { %1218 = vmatpush.bf16.msra.mxu2 %v1567_v63 }
 0x154   : > { %1204 = vmatpush.bf16.msra.mxu1 %v1563_v1 }
 0x1a5   : > { %v906_v15 = vpop.permute.xlu2 %905 }
 0x1a6   : > { %915 = vst.msk [vmem:[#allocation4 + $0x4] sm:$0xf] %vm400_vm12, %v906_v15 }
 0x1ad   : > { %v1667_v29 = vld [vmem:[#allocation4] sm:$0xf0] }
 0x1b4   : > { %v904_v20 = vpop.permute.xlu1 %903 }
 0x1b5   : > { %v913_v21 = vsel %vm2006_vm13, %v904_v20, %v912_v19  ;;  %v1147_v19 = vld [vmem:[%s2240_s7] sm:$0x3] }
 0x1b6   : > { %914 = vst [vmem:[#allocation4] sm:$0xf] %v913_v21  ;;  %v1149_v21 = vperm.slane %v1147_v19, 0 }
 0x1bc   : > { %v908_v23 = vpop.permute.xlu0 %907 }
 0x1bd   : > { %v917_v24 = vsel %vm2058_vm1, %v908_v23, %v916_v22  ;;  %v1627_v25 = vld [vmem:[#allocation4] sm:$0xff]  ;;  %v1150_v22 = vperm.slane %v1147_v19, 1 }
 0x1be   : > { %918 = vst [vmem:[#allocation4 + $0x8] sm:$0x1] %v917_v24  ;;  %1507 = vmatmul.msk.bf16.vlgmr.msrb.gmra.mxu2 %vm491_vm14, %v1627_v25  ;;  %v1658_v26 = vld [vmem:[#allocation4] sm:$0xff]  }
 0x1bf   : > { %v1668_v27 = vld [vmem:[#allocation4] sm:$0xe]  ;;  %v1012_v28 = vshll.u32 %v1658_v26, 16  ;;  %v1010_v37 = vshrl.u32 %v1658_v26, 16 }
 0x1c0   : > { %v1669_v33 = vor.u32 %v1668_v27, %v1667_v29 }
 0x1c1   : > { %v1014_v8 = vrot.slane %v1012_v28, 1 }
 0x1c2   : > { %v1084_v35 = vrot.slane %v1669_v33, 1 }
 0x1c3   : > { %v1015_v39 = vor.u32 %v1014_v8, %v1010_v37 }
 0x1c5   : > { %v990_v30 = vld [vmem:[#allocation4 + $0x8] sm:$0x1] }
 0x1c6   : > { %v1006_v32 = vunpack.c.l.b16 %v990_v30 }
 0x1c8   : > { %v1008_v34 = vpack.c.b16 %v1006_v32, %v1006_v32 }
 0x1ca   : > { %v1085_v36 = vrot.slane %v1008_v34, 1  ;;  %v1017_v38 = vshll.u32 %v1008_v34, 16 }
 0x1cc   : > { %v1086_v31 = vsel %vm763_vm0, %v1084_v35, %v1085_v36  ;;  %v1019_v40 = vrot.slane %v1017_v38, 1 }
 0x1cd   : > { %1559 = vmatmul.msk.bf16.vlgmr.msra.gmra.mxu0 %vm491_vm14, %v1086_v31 }
 0x1ce   : > { %v1020_v41 = vsel %vm605_vm2, %v1015_v39, %v1019_v40 }
 0x1cf   : > { %1533 = vmatmul.msk.bf16.vlgmr.msrb.gmra.mxu3 %vm491_vm14, %v1020_v41 }
 0x241   : > { %v978_v2 = vpop.f32.mrf.mxu2 }
 0x242   : > { %v986_v6 = vadd.f32 %v1714_v3, %v978_v2 }
 0x249   : > { %v980_v7 = vpop.f32.mrf.mxu2 }
 0x24a   : > { %v1129_v4 = vpop.f32.mrf.mxu0  ;;  %v987_v10 = vadd.f32 %v1714_v3, %v980_v7 }
 0x252   : > { %v1063_v5 = vpop.f32.mrf.mxu3  ;;  %v1131_v14 = vpop.f32.mrf.mxu0 }
 0x253   : > { %v1068_v9 = vadd.f32 %v1063_v5, %v986_v6 }
 0x255   : > { %v1134_v12 = vadd.f32 %v1129_v4, %v1068_v9 }
 0x257   : > { %v1136_v16 = vmax.f32 %v1134_v12, 0.0 }
 0x25a   : > { %v1065_v11 = vpop.f32.mrf.mxu3 }
 0x25b   : > { %v1069_v13 = vadd.f32 %v1065_v11, %v987_v10 }
 0x25d   : > { %v1135_v15 = vadd.f32 %v1131_v14, %v1069_v13 }
 0x25f   : > { %v1137_v17 = vmax.f32 %v1135_v15, 0.0 }
 0x261   : > { %v1138_v18 = vpack.c.bf16 %v1137_v17, %v1136_v16 }
 0x263   : > { %1592 = vmatmul.msk.bf16.vlgmr.msra.gmra.mxu1 %vm1193_vm3, %v1138_v18  ;;  %1593 = vmatmul.msk.bf16.vlgmr.msra.gmra.mxu2 %vm1193_vm3, %v1138_v18 }
 0x2e0   : > { %v1206_v20 = vpop.f32.mrf.mxu1 }
 0x2e1   : > { %v1207_v23 = vadd.f32 %v1206_v20, %v1149_v21 }
 0x2e3   : > { %v1225_v26 = vmax.f32 %v1207_v23, 0.0 }
 0x2e6   : > { %v1220_v24 = vpop.f32.mrf.mxu2 }
 0x2e7   : > { %v1221_v25 = vadd.f32 %v1220_v24, %v1150_v22 }
 0x2e8   : > { %v1208_v28 = vpop.f32.mrf.mxu1 }
 0x2e9   : > { %v1226_v27 = vmax.f32 %v1221_v25, 0.0  ;;  %v1209_v30 = vadd.f32 %v1208_v28, %v1149_v21 }
 0x2eb   : > { %v1229_v29 = vpack.c.bf16 %v1226_v27, %v1225_v26  ;;  %v1227_v34 = vmax.f32 %v1209_v30, 0.0 }
 0x2ed   : > { %1231 = vst [vmem:[%s313_s19] sm:$0xff] %v1229_v29 }
 0x2ee   : > { %v1222_v32 = vpop.f32.mrf.mxu2 }
 0x2ef   : > { %v1223_v33 = vadd.f32 %v1222_v32, %v1150_v22 }
 0x2f1   : > { %v1228_v8 = vmax.f32 %v1223_v33, 0.0 }
 0x2f3   : > { %v1230_v35 = vpack.c.bf16 %v1228_v8, %v1227_v34 }
 0x2f5   : > { %1232 = vst [vmem:[%s313_s19 + $0x8] sm:$0xff] %v1230_v35 }
 0x2f6   : > { %1742 = shalt.err (!%p1739_p3)
}
 0x2f7   : > { %s1781_s13 = smov 128   ;;  %s1782_s19 = smov 8  }
 0x2f8   : > { %1670 = dma.vmem_to_hbm [thread:$0]  (%p1866_p5), %s1247_s22, 256, %s1249_s23, %s1234_s9, %s1781_s13, %s1781_s13, %s1782_s19  }
 0x2f9 PF: > { %p1676_p4 = scmp.ge.s32.totalorder %s1777_s30, 2  ;;  %s1263_s10 = sand.u32 1, %s1765_s27  }
 0x2fa   : > { %s1264_s21 = scalar_lea.sflag [#allocation6], %s1263_s10 }
 0x2fb   : > { %p1673_p7 = pnand %p1676_p4, %p1870_p6 }
 0x2fd   : > { %p1674_p8 = pneg %p1673_p7 }
 0x2ff   : > { %1760 = dma.done.wait (%p1674_p8), %s1264_s21, 256  }
 0x300   : > { %1762 = vsyncadd (%p1674_p8), %s1264_s21, 4294967040  ;;  %p18_p9 = scmp.ge.s32.totalorder %s1853_s11, 4   ;;  %s2254_s27 = smov %s1769_s28 }
 0x301   : > { %s2255_s28 = smov %s1773_s29  ;;  %s2256_s29 = smov %s1864_s14 }
 0x302   : > { %s2257_s30 = smov %s1853_s11  ;;  %20 = sbr.rel (!%p18_p9) target bundleno = 3 (0x3), region = 97 }
 0x307   :  { %1270 = vsyncpa [#allocation6], 1 }
 0x308   :  { %1272 = vsyncpa [#allocation6 + $0x1], 1 }

</bundles_post_ra>
